<compile_context>
chip_gen: v7x
topology: tpu7x:2x2x1
jax: 0.10.0
libtpu: 0.0.40
codegen_flags: <defaults>
</compile_context>

<pallas_src>
import functools

import jax
import jax.numpy as jnp
import numpy as np
from jax.experimental import pallas as pl
from jax.experimental.pallas import tpu as pltpu


def _round_up(x: int, m: int) -> int:
    return ((x + m - 1) // m) * m


def _pick_n_tile(n: int, tn_cap: int, per_tile_penalty: int) -> int:
    """Rows per grid step: big enough to amortize per-step / re-stream cost,
    small enough to avoid gross padding waste."""
    tn_cap = max(8, (tn_cap // 8) * 8)
    if n <= tn_cap:
        return _round_up(n, 8)                      # single N tile, minimal pad
    cands = [c for c in (128, 256, 512, 1024) if c <= tn_cap] or [tn_cap]

    def cost(tn):
        n_pad = _round_up(n, tn)
        return ((n_pad - n) + (n_pad // tn) * per_tile_penalty, -tn)

    return min(cands, key=cost)


def _pick_k_tile(k: int, tk_max: int):
    """Codes per K tile (streaming path): multiple of 256, minimal padding."""
    k128 = _round_up(max(k, 1), 128)
    cands = list(range(512, max(tk_max, 512) + 1, 256))
    best = min(cands, key=lambda tk: (_round_up(k128, tk) - k, -tk))
    return best, _round_up(k128, best)


def _scores_and_argmax(x_ref, e_ref, tk):
    """One bf16 MXU matmul (bias folded into a spare contraction column) plus a
    slim first-occurrence argmax: max reduce, int32 iota/select, min reduce."""
    scores = jax.lax.dot_general(
        x_ref[...], e_ref[...],
        dimension_numbers=(((1,), (1,)), ((), ())),
        preferred_element_type=jnp.float32)                       # (TN, TK) f32
    tile_max = jnp.max(scores, axis=-1, keepdims=True)            # (TN, 1)
    col = jax.lax.broadcasted_iota(jnp.int32, (1, scores.shape[1]), 1)
    cand = jnp.where(scores == tile_max, col, tk)                 # int32
    tile_arg = jnp.min(cand, axis=-1, keepdims=True)              # (TN, 1) int32
    return tile_max, tile_arg


def _argmax_kernel_single(x_ref, e_ref, idx_ref, *, tk):
    """Codebook fully VMEM-resident: grid is N tiles only."""
    _, tile_arg = _scores_and_argmax(x_ref, e_ref, tk)
    idx_ref[...] = tile_arg


def _argmax_kernel_streamed(x_ref, e_ref, idx_ref, max_sc, arg_sc, *, tk):
    """Codebook streamed over the K grid axis with a running (max, argmax)."""
    k = pl.program_id(1)

    @pl.when(k == 0)
    def _init():
        max_sc[...] = jnp.full_like(max_sc, -jnp.inf)
        arg_sc[...] = jnp.zeros_like(arg_sc)

    tile_max, tile_arg = _scores_and_argmax(x_ref, e_ref, tk)
    tile_arg = tile_arg + k * tk

    better = tile_max > max_sc[...]        # strict '>' keeps earlier K tile on ties
    arg_sc[...] = jnp.where(better, tile_arg, arg_sc[...])
    max_sc[...] = jnp.where(better, tile_max, max_sc[...])

    @pl.when(k == pl.num_programs(1) - 1)
    def _finalize():
        idx_ref[...] = arg_sc[...]


@functools.partial(jax.jit, static_argnames=("interpret",))
def euclidean_codebook_forward(x, embed, *, interpret=False):
    """Eval-mode forward of EuclideanCodebook.

    Args:
      x: (..., D) input activations.
      embed: (K, D) codebook.
    Returns:
      (quantize, embed_ind): quantize.shape == x.shape, embed_ind int32 with
      shape x.shape[:-1].
    """
    orig_shape = x.shape
    orig_dtype = x.dtype
    D = orig_shape[-1]
    K = embed.shape[0]
    assert embed.shape[1] == D

    x_flat = x.reshape(-1, D)
    N = x_flat.shape[0]

    # ---- generation-aware budgets -------------------------------------------
    try:
        vmem_cap = int(pltpu.get_tpu_info().vmem_capacity_bytes)
    except Exception:              # non-TPU trace / interpret: assume smallest
        vmem_cap = 64 << 20
    big_vmem = vmem_cap >= (100 << 20)          # v5e/v6e: 128 MiB, v7x: 64 MiB
    vmem_limit = (64 << 20) if big_vmem else (30 << 20)

    # ---- padding / tile selection -------------------------------------------
    # Pad D with >= 1 spare column carrying the folded -0.5*|e|^2 bias
    # (x carries 1.0 there), so the score is a single matmul.
    D_pad = _round_up(D + 1, 128)
    bias_col = D
    K128 = _round_up(K, 128)

    # Keep the (bf16, double-buffered) codebook VMEM-resident across the whole
    # N axis when cheap; otherwise stream it over a K grid axis.
    resident_budget = (16 << 20) if big_vmem else (6 << 20)
    cb_bytes = 2 * K128 * D_pad * 2                      # 2 pipeline bufs, bf16
    resident = cb_bytes <= resident_budget

    if resident:
        TK = K_pad = K128
        # Leave room for the (TN, K_pad) f32 scores + select/iota temps.
        temp_budget = vmem_limit - cb_bytes - (6 << 20)
        tn_cap = min(1024, max(8, temp_budget // (3 * 4 * K_pad)))
        TN = _pick_n_tile(N, tn_cap, per_tile_penalty=16)
    else:
        TK, K_pad = _pick_k_tile(K, tk_max=2048 if big_vmem else 1024)
        # Large TN amortizes codebook re-streaming (re-read once per N tile).
        TN = _pick_n_tile(N, 1024 if big_vmem else 512, per_tile_penalty=384)
    N_pad = _round_up(N, TN)

    # ---- operand prep (bf16, bias folded) ------------------------------------
    xp = jnp.zeros((N_pad, D_pad), jnp.bfloat16)
    xp = xp.at[:N, :D].set(x_flat.astype(jnp.bfloat16))
    xp = xp.at[:, bias_col].set(1.0)                     # multiplies the bias column

    # NOTE: in a long-lived module this padded bf16 codebook only changes when
    # `embed` changes and should be prepared once and cached, not per call.
    e_f32 = embed.astype(jnp.float32)
    neg_half_sq = -0.5 * jnp.sum(e_f32 * e_f32, axis=1)              # (K,) f32
    bias_full = jnp.full((K_pad,), -1e30, jnp.float32).at[:K].set(neg_half_sq)
    e_pad = jnp.zeros((K_pad, D_pad), jnp.bfloat16)
    e_pad = e_pad.at[:K, :D].set(embed.astype(jnp.bfloat16))
    e_pad = e_pad.at[:, bias_col].set(bias_full.astype(jnp.bfloat16))

    # ---- pallas_call ----------------------------------------------------------
    if resident:
        grid = (N_pad // TN,)
        kernel = functools.partial(_argmax_kernel_single, tk=TK)
        in_specs = [
            pl.BlockSpec((TN, D_pad), lambda i: (i, 0)),
            pl.BlockSpec((K_pad, D_pad), lambda i: (0, 0)),   # stays resident
        ]
        out_specs = pl.BlockSpec((TN, 1), lambda i: (i, 0))
        scratch_shapes = []
        dim_sem = ("parallel",)
    else:
        grid = (N_pad // TN, K_pad // TK)
        kernel = functools.partial(_argmax_kernel_streamed, tk=TK)
        try:
            e_spec = pl.BlockSpec((TK, D_pad), lambda i, k: (k, 0),
                                  pipeline_mode=pl.Buffered(3))
        except TypeError:  # older BlockSpec without pipeline_mode
            e_spec = pl.BlockSpec((TK, D_pad), lambda i, k: (k, 0))
        in_specs = [
            pl.BlockSpec((TN, D_pad), lambda i, k: (i, 0)),
            e_spec,
        ]
        out_specs = pl.BlockSpec((TN, 1), lambda i, k: (i, 0))
        scratch_shapes = [pltpu.VMEM((TN, 1), jnp.float32),
                          pltpu.VMEM((TN, 1), jnp.int32)]
        # NOTE: on v7x megacore, 'parallel' N-sharding makes each core re-stream
        # the codebook; acceptable given v7x's 3.2 TB/s HBM.
        dim_sem = ("parallel", "arbitrary")

    idx = pl.pallas_call(
        kernel,
        out_shape=jax.ShapeDtypeStruct((N_pad, 1), jnp.int32),
        grid_spec=pltpu.PrefetchScalarGridSpec(
            num_scalar_prefetch=0,
            grid=grid,
            in_specs=in_specs,
            out_specs=out_specs,
            scratch_shapes=scratch_shapes,
        ),
        compiler_params=pltpu.CompilerParams(
            dimension_semantics=dim_sem,
            vmem_limit_bytes=vmem_limit,
        ),
        interpret=interpret,
    )(xp, e_pad)

    embed_ind = idx[:N, 0]                                       # (N,) int32
    # Dequantize with a gather from the original-dtype codebook (no f32 copy,
    # no one-hot @ embed MXU pass).
    quantize = jnp.take(embed, embed_ind, axis=0).astype(orig_dtype)

    return quantize.reshape(orig_shape), embed_ind.reshape(orig_shape[:-1])


def _reference_forward(x, embed):
    """Pure-JAX reference matching the PyTorch quantize()/dequantize() path."""
    D = x.shape[-1]
    x_flat = x.reshape(-1, D).astype(jnp.float32)
    e = embed.astype(jnp.float32)
    dist = -(jnp.sum(x_flat ** 2, axis=1, keepdims=True)
             - 2.0 * x_flat @ e.T
             + jnp.sum(e ** 2, axis=1)[None, :])
    ind = jnp.argmax(dist, axis=-1).astype(jnp.int32)
    q = jnp.take(e, ind, axis=0).astype(x.dtype)
    return q.reshape(x.shape), ind.reshape(x.shape[:-1])


if __name__ == "__main__":
    key = jax.random.PRNGKey(0)
    k_x, k_e = jax.random.split(key)

    B, T, D, K = 2, 64, 64, 256          # small shapes: x is (batch, seq, dim)
    x = jax.random.normal(k_x, (B, T, D), dtype=jnp.float32)
    # kaiming-uniform-ish codebook init
    bound = (6.0 / D) ** 0.5
    embed = jax.random.uniform(k_e, (K, D), minval=-bound, maxval=bound,
                               dtype=jnp.float32)

    quantize, embed_ind = euclidean_codebook_forward(x, embed)
    quantize = jax.block_until_ready(quantize)
    embed_ind = jax.block_until_ready(embed_ind)

    assert quantize.shape == x.shape and embed_ind.shape == x.shape[:-1]
    assert embed_ind.dtype == jnp.int32

    # Correctness vs. pure-JAX reference. bf16 MXU operands may flip a rare
    # near-tie, so check (a) the chosen code is (near-)optimal in true f32
    # distance and (b) index agreement is high.
    q_ref, ind_ref = _reference_forward(x, embed)
    x2 = np.asarray(x).reshape(-1, D)
    e_np = np.asarray(embed)

    def true_dist(ind):
        chosen = e_np[np.asarray(ind).reshape(-1)]
        return np.sum((x2 - chosen) ** 2, axis=-1)

    d_kernel = true_dist(embed_ind)
    d_ref = true_dist(ind_ref)
    assert np.all(d_kernel <= d_ref + 1e-2 + 1e-2 * np.abs(d_ref)), \
        "kernel picked a clearly non-nearest code"
    match = float(np.mean(np.asarray(embed_ind) == np.asarray(ind_ref)))
    assert match >= 0.95, f"index mismatch fraction too high: {1.0 - match:.4f}"
    # Dequantized rows must equal the codebook rows of the chosen indices.
    np.testing.assert_allclose(
        np.asarray(quantize).reshape(-1, D),
        e_np[np.asarray(embed_ind).reshape(-1)], rtol=0, atol=0)

    print("KERNEL_OK")
</pallas_src>

<mosaic_0001>
module attributes {stable_mosaic.version = 11 : i64} {
  func.func @_argmax_kernel_single(%arg0: i32, %arg1: memref<128x128xbf16, #tpu.memory_space<vmem>>, %arg2: memref<256x128xbf16, #tpu.memory_space<vmem>>, %arg3: memref<128x1xi32, #tpu.memory_space<vmem>>) attributes {dimension_semantics = [#tpu.dimension_semantics<parallel>], iteration_bounds = array<i64: 1>, scalar_prefetch = 0 : i64, scratch_operands = 0 : i64, tpu.core_type = #tpu.core_type<tc>, window_params = [{transform_indices = @transform_0, window_bounds = array<i64: 128, 128>}, {pipeline_mode = #tpu.pipeline_mode<synchronous>, transform_indices = @transform_1, window_bounds = array<i64: 256, 128>}, {transform_indices = @transform_2, window_bounds = array<i64: 128, 1>}]} {
    %c0 = arith.constant 0 : index
    %c0_0 = arith.constant 0 : index
    %0 = vector.load %arg1[%c0, %c0_0] : memref<128x128xbf16, #tpu.memory_space<vmem>>, vector<128x128xbf16>
    %c0_1 = arith.constant 0 : index
    %c0_2 = arith.constant 0 : index
    %1 = vector.load %arg2[%c0_1, %c0_2] : memref<256x128xbf16, #tpu.memory_space<vmem>>, vector<256x128xbf16>
    %cst = arith.constant dense<0.000000e+00> : vector<128x256xf32>
    %2 = tpu.matmul %0, %1, %cst {dimension_numbers = #tpu.dot_dimension_numbers<[1], [1], [0], [0], [0, 0, 1, 0], [], []>} : vector<128x128xbf16>, vector<256x128xbf16>, vector<128x256xf32> -> vector<128x256xf32>
    %cst_3 = arith.constant dense<0xFF800000> : vector<128xf32>
    %3 = vector.multi_reduction <maximumf>, %2, %cst_3 [1] : vector<128x256xf32> to vector<128xf32>
    %4 = vector.shape_cast %3 : vector<128xf32> to vector<128x1xf32>
    %5 = tpu.iota {dimensions = array<i32: 1>} : vector<1x256xi32>
    %6 = vector.broadcast %4 : vector<128x1xf32> to vector<128x256xf32>
    %7 = arith.cmpf oeq, %2, %6 : vector<128x256xf32>
    %c256_i32 = arith.constant 256 : i32
    %8 = vector.shape_cast %5 : vector<1x256xi32> to vector<1x256xi32>
    %9 = vector.broadcast %8 : vector<1x256xi32> to vector<128x256xi32>
    %10 = vector.broadcast %c256_i32 : i32 to vector<128x256xi32>
    %11 = arith.select %7, %9, %10 : vector<128x256xi1>, vector<128x256xi32>
    %cst_4 = arith.constant dense<2147483647> : vector<128xi32>
    %12 = vector.multi_reduction <minsi>, %11, %cst_4 [1] : vector<128x256xi32> to vector<128xi32>
    %13 = vector.shape_cast %12 : vector<128xi32> to vector<128x1xi32>
    %c0_5 = arith.constant 0 : index
    %c0_6 = arith.constant 0 : index
    %14 = vector.load %arg3[%c0_5, %c0_6] : memref<128x1xi32, #tpu.memory_space<vmem>>, vector<128x1xi32>
    tpu.vector_store %arg3[%c0_5, %c0_6], %13 {strides = array<i32>} : memref<128x1xi32, #tpu.memory_space<vmem>>, vector<128x1xi32>,
    return
  }
  func.func @transform_0(%arg0: i32) -> (i32, i32) {
    %c0_i32 = arith.constant 0 : i32
    %c0_i32_0 = arith.constant 0 : i32
    return %arg0, %c0_i32 : i32, i32
  }
  func.func @transform_1(%arg0: i32) -> (i32, i32) {
    %c0_i32 = arith.constant 0 : i32
    %c0_i32_0 = arith.constant 0 : i32
    %c0_i32_1 = arith.constant 0 : i32
    return %c0_i32, %c0_i32_0 : i32, i32
  }
  func.func @transform_2(%arg0: i32) -> (i32, i32) {
    %c0_i32 = arith.constant 0 : i32
    %c0_i32_0 = arith.constant 0 : i32
    return %arg0, %c0_i32 : i32, i32
  }
}

</mosaic_0001>

<bundles_post_ra>
// kernel: squeeze.3
= control target key start
LH: loop header
LB: loop body
LE: loop exit
PB: predicated region body
PF: predicated region fallthrough
CT: control target
= control target key end

     0   :  { %s85_s0 = inlined_call_operand.vmem [shape: s32[128], index: 0, kind: input, shape index: {}]   ;;  %s86_s1 = inlined_call_operand.hbm [shape: s32[2,64], index: 1, kind: output, shape index: {}]  }
   0x1   :  { %v5_v0 = vld [vmem:[%s85_s0] sm:$0x1] }
   0x2   :  { %2 = vsyncpa [#allocation1], 0  ;;  %6 = vst [vmem:[#allocation3] sm:$0x1] %v5_v0  ;;  %vm8_vm0 = vcmask 523264   ;;  %s58_s0 = smov 64  }
   0x3   :  { %s59_s8 = smov [#allocation0]  }
   0x4   :  { %s26_s9 = sshll.u32 %s59_s8, 4  ;;  %s27_s9 = int_to_ptr.vmem [resolvable:$true] %s26_s9 }
   0x5   :  { %s34_s10 = scalar_lea.vmem %s27_s9, 32  ;;  %p39_p1 = scmp.lt.s32.totalorder %s27_s9, %s27_s9 }
   0x6   :  { %p35_p0 = scmp.ne.s32.totalorder %s27_s9, %s34_s10  ;;  %p40_p2 = scmp.lt.s32.totalorder %s34_s10, %s34_s10 }
   0x8   :  { %p41_p3 = por %p40_p2, %p39_p1 }
   0x9   :  { %v10_v1 = vld [vmem:[#allocation3] sm:$0x1]  }
   0xa   :  { %v7_v2 = vld [vmem:[#allocation3] sm:$0x1]   ;;  %11 = vrot.lane.b32.xlu0 %v10_v1, %s58_s0  ;;  %p42_p4 = pnand %p41_p3, %p35_p0 }
   0xb   :  { %9 = vst.msk [vmem:[#allocation2] sm:$0x1] %vm8_vm0, %v7_v2  }
  0x7c   :  { %v12_v3 = vpop.permute.xlu0 %11  }
  0x7d   :  { %15 = vst.msk [vmem:[#allocation2 + $0x1] sm:$0x1] %vm8_vm0, %v12_v3  }
  0x84   :  { %v19_v4 = vld [vmem:[#allocation2] sm:$0x3] }
  0x85   :  { %21 = vst [vmem:[#allocation0] sm:$0x3] %v19_v4 }
  0x86   :  { %45 = shalt.err (!%p42_p4)
}
  0x87   :  { %s46_s13 = scalar_lea.hbm %s86_s1, 32 }
  0x88   :  { %p47_p5 = scmp.ne.s32.totalorder %s86_s1, %s46_s13  ;;  %p50_p6 = scmp.lt.u32.totalorder %s46_s13, %s86_s1 }
  0x8a   :  { %p52_p7 = pnand %p50_p6, %p47_p5 }
  0x8c   :  { %55 = shalt.err (!%p52_p7)
}
  0x8d   :  { %29 = dma.vmem_to_hbm [thread:$0]  %s27_s9, 32, %s86_s1, [#allocation1]  }
  0x8e   :  { %56 = dma.done.wait [#allocation1], 32  }
  0x8f   :  { %57 = vsyncadd [#allocation1], 4294967264 }
  0x90   :  { %31 = vsyncpa [#allocation1], 1 }

// kernel: euclidean_codebook_forward.1
= control target key start
LH: loop header
LB: loop body
LE: loop exit
PB: predicated region body
PF: predicated region fallthrough
CT: control target
= control target key end

     0   :  { %s1315_s1 = inlined_call_operand.vmem [shape: bf16[256,128], index: 1, kind: input, shape index: {}]   ;;  %s1316_s0 = inlined_call_operand.vmem [shape: bf16[128,128], index: 0, kind: input, shape index: {}]   ;;  %s1317_s2 = inlined_call_operand.vmem [shape: s32[128,1], index: 2, kind: output, shape index: {}]  }
   0x1   :  { %v781_v0 = vld [vmem:[%s1315_s1 + $0x40] sm:$0xff]   ;;  %v783_v2 = vld [vmem:[%s1315_s1 + $0x48] sm:$0xff]   ;;  %v785_v4 = vld [vmem:[%s1315_s1 + $0x50] sm:$0xff]  }
   0x2   :  { %v782_v1 = vld [vmem:[%s1315_s1] sm:$0xff]   ;;  %733 = vmatprep.subr.bf16.mxu0 %v781_v0  ;;  %765 = vmatprep.subr.bf16.mxu1 %v781_v0  ;;  %v784_v3 = vld [vmem:[%s1315_s1 + $0x8] sm:$0xff]   ;;  %v786_v5 = vld [vmem:[%s1315_s1 + $0x10] sm:$0xff]  }
   0x3   :  { %734 = vmatpush3.bf16.xpose.msra.mxu0 %v782_v1  ;;  %773 = vmatpush3.bf16.xpose.msra.mxu1 %v782_v1  ;;  %v787_v6 = vld [vmem:[%s1315_s1 + $0x58] sm:$0xff]   ;;  %v797_v7 = vld [vmem:[%s1316_s0] sm:$0xff]   ;;  %v791_v12 = vld [vmem:[%s1315_s1 + $0x68] sm:$0xff]  }
   0x4   :  { %735 = vmatprep.subr.bf16.mxu0 %v783_v2  ;;  %766 = vmatprep.subr.bf16.mxu1 %v783_v2  ;;  %v798_v8 = vld [vmem:[%s1316_s0 + $0x20] sm:$0xff]   ;;  %v788_v9 = vld [vmem:[%s1315_s1 + $0x18] sm:$0xff]   ;;  %v792_v13 = vld [vmem:[%s1315_s1 + $0x28] sm:$0xff]  }
   0x5   :  { %749 = vmatprep.mubr.bf16.mxu0 %v797_v7  ;;  %757 = vmatprep.mubr.bf16.mxu1 %v798_v8  ;;  %v789_v10 = vld [vmem:[%s1315_s1 + $0x60] sm:$0xff]   ;;  %v793_v14 = vld [vmem:[%s1315_s1 + $0x70] sm:$0xff]   ;;  %v795_v16 = vld [vmem:[%s1315_s1 + $0x78] sm:$0xff]  }
   0x6   :  { %v790_v11 = vld [vmem:[%s1315_s1 + $0x20] sm:$0xff]   ;;  %v794_v15 = vld [vmem:[%s1315_s1 + $0x30] sm:$0xff]   ;;  %v796_v17 = vld [vmem:[%s1315_s1 + $0x38] sm:$0xff]  }
   0x7   :  { %v799_v18 = vld [vmem:[%s1316_s0 + $0x8] sm:$0xff]   ;;  %v801_v20 = vld [vmem:[%s1316_s0 + $0x10] sm:$0xff]   ;;  %v803_v22 = vld [vmem:[%s1316_s0 + $0x18] sm:$0xff]  }
   0x8   :  { %v800_v19 = vld [vmem:[%s1316_s0 + $0x28] sm:$0xff]   ;;  %v802_v21 = vld [vmem:[%s1316_s0 + $0x30] sm:$0xff]   ;;  %v804_v23 = vld [vmem:[%s1316_s0 + $0x38] sm:$0xff]  }
   0xb   :  { %736 = vmatpush3.bf16.xpose.msra.mxu0 %v784_v3  ;;  %774 = vmatpush3.bf16.xpose.msra.mxu1 %v784_v3 }
   0xc   :  { %737 = vmatprep.subr.bf16.mxu0 %v785_v4  ;;  %767 = vmatprep.subr.bf16.mxu1 %v785_v4 }
  0x13   :  { %738 = vmatpush3.bf16.xpose.msra.mxu0 %v786_v5  ;;  %775 = vmatpush3.bf16.xpose.msra.mxu1 %v786_v5 }
  0x14   :  { %739 = vmatprep.subr.bf16.mxu0 %v787_v6  ;;  %768 = vmatprep.subr.bf16.mxu1 %v787_v6 }
  0x1b   :  { %740 = vmatpush3.bf16.xpose.msra.mxu0 %v788_v9  ;;  %776 = vmatpush3.bf16.xpose.msra.mxu1 %v788_v9 }
  0x1c   :  { %741 = vmatprep.subr.bf16.mxu0 %v789_v10  ;;  %769 = vmatprep.subr.bf16.mxu1 %v789_v10 }
  0x23   :  { %742 = vmatpush3.bf16.xpose.msra.mxu0 %v790_v11  ;;  %777 = vmatpush3.bf16.xpose.msra.mxu1 %v790_v11 }
  0x24   :  { %743 = vmatprep.subr.bf16.mxu0 %v791_v12  ;;  %770 = vmatprep.subr.bf16.mxu1 %v791_v12 }
  0x2b   :  { %744 = vmatpush3.bf16.xpose.msra.mxu0 %v792_v13  ;;  %778 = vmatpush3.bf16.xpose.msra.mxu1 %v792_v13 }
  0x2c   :  { %745 = vmatprep.subr.bf16.mxu0 %v793_v14  ;;  %771 = vmatprep.subr.bf16.mxu1 %v793_v14 }
  0x33   :  { %746 = vmatpush3.bf16.xpose.msra.mxu0 %v794_v15  ;;  %779 = vmatpush3.bf16.xpose.msra.mxu1 %v794_v15 }
  0x34   :  { %747 = vmatprep.subr.bf16.mxu0 %v795_v16  ;;  %772 = vmatprep.subr.bf16.mxu1 %v795_v16 }
  0x3b   :  { %748 = vmatpush3.bf16.xpose.msra.mxu0 %v796_v17  ;;  %780 = vmatpush3.bf16.xpose.msra.mxu1 %v796_v17 }
  0x42   :  { %750 = vmatmul.mubr.bf16.vlgmr.msra.gmra.mrb[0].mxu0 %v797_v7  ;;  %758 = vmatmul.mubr.bf16.vlgmr.msra.gmra.mrb[0].mxu1 %v798_v8  ;;  %v365_v8 = vlaneseq }
  0x43   :  { %751 = vmatprep.mubr.bf16.mxu0 %v799_v18  ;;  %759 = vmatprep.mubr.bf16.mxu1 %v800_v19 }
  0x44   :  { %v988_v9 = vand.u32 127, %v365_v8 }
  0x46   :  { %v991_v10 = vadd.s32 128, %v988_v9 }
  0x4a   :  { %752 = vmatmul.mubr.bf16.gmra.mrb[4].mxu0 %v799_v18  ;;  %760 = vmatmul.mubr.bf16.gmra.mrb[4].mxu1 %v800_v19 }
  0x4b   :  { %753 = vmatprep.mubr.bf16.mxu0 %v801_v20  ;;  %761 = vmatprep.mubr.bf16.mxu1 %v802_v21 }
  0x52   :  { %754 = vmatmul.mubr.bf16.gmra.mrb[8].mxu0 %v801_v20  ;;  %762 = vmatmul.mubr.bf16.gmra.mrb[8].mxu1 %v802_v21 }
  0x53   :  { %755 = vmatprep.mubr.bf16.mxu0 %v803_v22  ;;  %763 = vmatprep.mubr.bf16.mxu1 %v804_v23 }
  0x5a   :  { %756 = vmatmul.mubr.bf16.gmra.mrb[12].mxu0 %v803_v22  ;;  %764 = vmatmul.mubr.bf16.gmra.mrb[12].mxu1 %v804_v23 }
 0x115   :  { %v892_v24 = vpop.f32.mrb[0].mxu0  ;;  %v894_v25 = vpop.f32.mrb[0].mxu1 }
 0x116   :  { %v896_v26 = vpop.f32.mrb[1].mxu0  ;;  %v898_v27 = vpop.f32.mrb[1].mxu1 }
 0x117   :  { %v900_v28 = vpop.f32.mrb[2].mxu0  ;;  %v902_v29 = vpop.f32.mrb[2].mxu1  ;;  %v317_v30 = vmax.f32 %v892_v24, %v896_v26  ;;  %v341_v31 = vmax.f32 %v894_v25, %v898_v27 }
 0x118   :  { %v908_v32 = vpop.f32.mrb[3].mxu0  ;;  %v910_v33 = vpop.f32.mrb[3].mxu1 }
 0x119   :  { %318 = vmax.xlane.f32.xlu0 %v317_v30  ;;  %v344_v34 = vmax.f32 %v902_v29, %v910_v33  ;;  %v320_v35 = vmax.f32 %v900_v28, %v908_v32 }
 0x11b   :  { %345 = vmax.xlane.f32.xlu1 %v344_v34 }
 0x11d   :  { %342 = vmax.xlane.f32.xlu0 %v341_v31  ;;  %v916_v36 = vpop.f32.mrb[4].mxu0  ;;  %v918_v37 = vpop.f32.mrb[4].mxu1 }
 0x11e   :  { %v920_v38 = vpop.f32.mrb[5].mxu0  ;;  %v922_v39 = vpop.f32.mrb[5].mxu1 }
 0x11f   :  { %v924_v40 = vpop.f32.mrb[6].mxu0  ;;  %v323_v41 = vmax.f32 %v916_v36, %v920_v38  ;;  %v928_v42 = vpop.f32.mrb[6].mxu1  ;;  %v347_v43 = vmax.f32 %v918_v37, %v922_v39 }
 0x120   :  { %v932_v44 = vpop.f32.mrb[7].mxu0  ;;  %v934_v45 = vpop.f32.mrb[7].mxu1 }
 0x121   :  { %321 = vmax.xlane.f32.xlu0 %v320_v35  ;;  %324 = vmax.xlane.f32.xlu1 %v323_v41  ;;  %v326_v46 = vmax.f32 %v924_v40, %v932_v44  ;;  %v350_v47 = vmax.f32 %v928_v42, %v934_v45 }
 0x125   :  { %348 = vmax.xlane.f32.xlu0 %v347_v43  ;;  %327 = vmax.xlane.f32.xlu1 %v326_v46  ;;  %v940_v48 = vpop.f32.mrb[8].mxu0  ;;  %v942_v49 = vpop.f32.mrb[8].mxu1 }
 0x126   :  { %v944_v50 = vpop.f32.mrb[9].mxu0  ;;  %v946_v51 = vpop.f32.mrb[9].mxu1 }
 0x127   :  { %v329_v52 = vmax.f32 %v940_v48, %v944_v50  ;;  %v950_v53 = vpop.f32.mrb[10].mxu0  ;;  %v952_v54 = vpop.f32.mrb[10].mxu1  ;;  %v353_v55 = vmax.f32 %v942_v49, %v946_v51 }
 0x128   :  { %v956_v56 = vpop.f32.mrb[11].mxu0  ;;  %v958_v57 = vpop.f32.mrb[11].mxu1 }
 0x129   :  { %351 = vmax.xlane.f32.xlu1 %v350_v47  ;;  %330 = vmax.xlane.f32.xlu0 %v329_v52  ;;  %v332_v58 = vmax.f32 %v950_v53, %v956_v56  ;;  %v356_v59 = vmax.f32 %v952_v54, %v958_v57 }
 0x12d   :  { %354 = vmax.xlane.f32.xlu0 %v353_v55  ;;  %333 = vmax.xlane.f32.xlu1 %v332_v58  ;;  %v964_v60 = vpop.f32.mrb[12].mxu0  ;;  %v966_v61 = vpop.f32.mrb[12].mxu1 }
 0x12e   :  { %v968_v62 = vpop.f32.mrb[13].mxu0  ;;  %v970_v63 = vpop.f32.mrb[13].mxu1 }
 0x12f   :  { %v335_v0 = vmax.f32 %v964_v60, %v968_v62  ;;  %v974_v1 = vpop.f32.mrb[14].mxu0  ;;  %v976_v2 = vpop.f32.mrb[14].mxu1  ;;  %v359_v3 = vmax.f32 %v966_v61, %v970_v63 }
 0x130   :  { %v980_v4 = vpop.f32.mrb[15].mxu0  ;;  %v982_v5 = vpop.f32.mrb[15].mxu1 }
 0x131   :  { %357 = vmax.xlane.f32.xlu1 %v356_v59  ;;  %336 = vmax.xlane.f32.xlu0 %v335_v0  ;;  %v338_v6 = vmax.f32 %v974_v1, %v980_v4  ;;  %v362_v7 = vmax.f32 %v976_v2, %v982_v5 }
 0x135   :  { %360 = vmax.xlane.f32.xlu0 %v359_v3  ;;  %339 = vmax.xlane.f32.xlu1 %v338_v6 }
 0x139   :  { %363 = vmax.xlane.f32.xlu1 %v362_v7 }
 0x1a6   :  { %v319_v11 = vpop.xlane.xlu0 %318 }
 0x1a7   :  { %vm368_vm0 = vcmp.eq.f32.partialorder %v892_v24, %v319_v11  ;;  %vm369_vm1 = vcmp.eq.f32.partialorder %v896_v26, %v319_v11 }
 0x1a8   :  { %v400_v12 = vsel %vm368_vm0, %v988_v9, 256  ;;  %v401_v13 = vsel %vm369_vm1, %v991_v10, 256  ;;  %v346_v14 = vpop.xlane.xlu1 %345 }
 0x1a9   :  { %vm432_vm2 = vcmp.lt.s32.totalorder %v400_v12, %v401_v13  ;;  %vm386_vm3 = vcmp.eq.f32.partialorder %v902_v29, %v346_v14  ;;  %vm387_vm4 = vcmp.eq.f32.partialorder %v910_v33, %v346_v14 }
 0x1aa   :  { %v418_v15 = vsel %vm386_vm3, %v988_v9, 256  ;;  %v419_v16 = vsel %vm387_vm4, %v991_v10, 256  ;;  %v343_v17 = vpop.xlane.xlu0 %342  ;;  %v1001_v18 = vsel %vm432_vm2, %v400_v12, %v401_v13 }
 0x1ab   :  { %vm576_vm5 = vcmp.lt.s32.totalorder %v418_v15, %v419_v16  ;;  %vm384_vm6 = vcmp.eq.f32.partialorder %v894_v25, %v343_v17  ;;  %vm385_vm7 = vcmp.eq.f32.partialorder %v898_v27, %v343_v17  ;;  %v435_v19 = vshra.s32 %v1001_v18, 16 }
 0x1ac   :  { %v416_v20 = vsel %vm384_vm6, %v988_v9, 256  ;;  %v417_v21 = vsel %vm385_vm7, %v991_v10, 256  ;;  %v1008_v22 = vsel %vm576_vm5, %v418_v15, %v419_v16 }
 0x1ad   :  { %vm560_vm8 = vcmp.lt.s32.totalorder %v416_v20, %v417_v21  ;;  %v1010_v23 = vcvt.s32.f32 %v435_v19 }
 0x1ae   :  { %v322_v24 = vpop.xlane.xlu0 %321  ;;  %v325_v26 = vpop.xlane.xlu1 %324  ;;  %v1012_v29 = vsel %vm560_vm8, %v416_v20, %v417_v21 }
 0x1af   :  { %vm370_vm9 = vcmp.eq.f32.partialorder %v900_v28, %v322_v24  ;;  %vm371_vm10 = vcmp.eq.f32.partialorder %v908_v32, %v322_v24  ;;  %vm372_vm11 = vcmp.eq.f32.partialorder %v916_v36, %v325_v26  ;;  %vm373_vm12 = vcmp.eq.f32.partialorder %v920_v38, %v325_v26  ;;  %438 = vmin.xlane.f32.xlu0 %v1010_v23 }
 0x1b0   :  { %v402_v25 = vsel %vm370_vm9, %v988_v9, 256  ;;  %v403_v27 = vsel %vm371_vm10, %v991_v10, 256  ;;  %v404_v30 = vsel %vm372_vm11, %v988_v9, 256  ;;  %v405_v31 = vsel %vm373_vm12, %v991_v10, 256 }
 0x1b1   :  { %vm448_vm13 = vcmp.lt.s32.totalorder %v402_v25, %v403_v27  ;;  %vm464_vm14 = vcmp.lt.s32.totalorder %v404_v30, %v405_v31  ;;  %v563_v28 = vshra.s32 %v1012_v29, 16 }
 0x1b2   :  { %v349_v33 = vpop.xlane.xlu0 %348  ;;  %v328_v32 = vpop.xlane.xlu1 %327  ;;  %v1024_v34 = vsel %vm464_vm14, %v404_v30, %v405_v31  ;;  %v1026_v35 = vsel %vm448_vm13, %v402_v25, %v403_v27 }
 0x1b3   :  { %vm388_vm15 = vcmp.eq.f32.partialorder %v918_v37, %v349_v33  ;;  %vm389_vm0 = vcmp.eq.f32.partialorder %v922_v39, %v349_v33  ;;  %vm374_vm1 = vcmp.eq.f32.partialorder %v924_v40, %v328_v32  ;;  %vm375_vm2 = vcmp.eq.f32.partialorder %v932_v44, %v328_v32 }
 0x1b4   :  { %v420_v36 = vsel %vm388_vm15, %v988_v9, 256  ;;  %v421_v38 = vsel %vm389_vm0, %v991_v10, 256  ;;  %v406_v41 = vsel %vm374_vm1, %v988_v9, 256  ;;  %v407_v43 = vsel %vm375_vm2, %v991_v10, 256 }
 0x1b5   :  { %vm592_vm3 = vcmp.lt.s32.totalorder %v420_v36, %v421_v38  ;;  %vm480_vm4 = vcmp.lt.s32.totalorder %v406_v41, %v407_v43  ;;  %v1036_v46 = vcvt.s32.f32 %v563_v28  ;;  %v467_v37 = vshra.s32 %v1024_v34, 16 }
 0x1b6   :  { %v352_v47 = vpop.xlane.xlu1 %351  ;;  %v331_v39 = vpop.xlane.xlu0 %330  ;;  %v451_v40 = vshra.s32 %v1026_v35, 16  ;;  %v1040_v52 = vsel %vm592_vm3, %v420_v36, %v421_v38  ;;  %v579_v44 = vshra.s32 %v1008_v22, 16  ;;  %v1043_v55 = vsel %vm480_vm4, %v406_v41, %v407_v43 }
 0x1b7   :  { %566 = vmin.xlane.f32.xlu0 %v1036_v46  ;;  %vm390_vm5 = vcmp.eq.f32.partialorder %v928_v42, %v352_v47  ;;  %vm391_vm6 = vcmp.eq.f32.partialorder %v934_v45, %v352_v47  ;;  %vm376_vm7 = vcmp.eq.f32.partialorder %v940_v48, %v331_v39  ;;  %vm377_vm8 = vcmp.eq.f32.partialorder %v944_v50, %v331_v39 }
 0x1b8   :  { %v422_v58 = vsel %vm390_vm5, %v988_v9, 256  ;;  %v423_v59 = vsel %vm391_vm6, %v991_v10, 256  ;;  %v408_v0 = vsel %vm376_vm7, %v988_v9, 256  ;;  %v409_v3 = vsel %vm377_vm8, %v991_v10, 256 }
 0x1b9   :  { %vm608_vm9 = vcmp.lt.s32.totalorder %v422_v58, %v423_v59  ;;  %vm496_vm10 = vcmp.lt.s32.totalorder %v408_v0, %v409_v3  ;;  %v1054_v6 = vcvt.s32.f32 %v467_v37  ;;  %v1056_v7 = vcvt.s32.f32 %v451_v40 }
 0x1ba   :  { %v355_v42 = vpop.xlane.xlu0 %354  ;;  %v334_v45 = vpop.xlane.xlu1 %333  ;;  %v595_v48 = vshra.s32 %v1040_v52, 16  ;;  %v1059_v8 = vcvt.s32.f32 %v579_v44  ;;  %v1061_v50 = vsel %vm496_vm10, %v408_v0, %v409_v3  ;;  %v1063_v11 = vsel %vm608_vm9, %v422_v58, %v423_v59 }
 0x1bb   :  { %470 = vmin.xlane.f32.xlu0 %v1054_v6  ;;  %454 = vmin.xlane.f32.xlu1 %v1056_v7  ;;  %vm392_vm11 = vcmp.eq.f32.partialorder %v942_v49, %v355_v42  ;;  %vm393_vm12 = vcmp.eq.f32.partialorder %v946_v51, %v355_v42  ;;  %vm378_vm13 = vcmp.eq.f32.partialorder %v950_v53, %v334_v45  ;;  %v499_v12 = vshra.s32 %v1061_v50, 16 }
 0x1bc   :  { %v424_v13 = vsel %vm392_vm11, %v988_v9, 256  ;;  %v425_v14 = vsel %vm393_vm12, %v991_v10, 256  ;;  %vm379_vm14 = vcmp.eq.f32.partialorder %v956_v56, %v334_v45  ;;  %v410_v15 = vsel %vm378_vm13, %v988_v9, 256 }
 0x1bd   :  { %vm624_vm15 = vcmp.lt.s32.totalorder %v424_v13, %v425_v14  ;;  %v411_v16 = vsel %vm379_vm14, %v991_v10, 256  ;;  %v1076_v17 = vcvt.s32.f32 %v595_v48  ;;  %v483_v49 = vshra.s32 %v1043_v55, 16 }
 0x1be   :  { %vm512_vm0 = vcmp.lt.s32.totalorder %v410_v15, %v411_v16  ;;  %v358_v51 = vpop.xlane.xlu1 %357  ;;  %v337_v53 = vpop.xlane.xlu0 %336  ;;  %v1079_v19 = vcvt.s32.f32 %v499_v12  ;;  %v1081_v20 = vsel %vm624_vm15, %v424_v13, %v425_v14  ;;  %v611_v21 = vshra.s32 %v1063_v11, 16 }
 0x1bf   :  { %598 = vmin.xlane.f32.xlu0 %v1076_v17  ;;  %582 = vmin.xlane.f32.xlu1 %v1059_v8  ;;  %vm394_vm1 = vcmp.eq.f32.partialorder %v952_v54, %v358_v51  ;;  %vm395_vm2 = vcmp.eq.f32.partialorder %v958_v57, %v358_v51  ;;  %vm380_vm3 = vcmp.eq.f32.partialorder %v964_v60, %v337_v53  ;;  %v627_v56 = vshra.s32 %v1081_v20, 16 }
 0x1c0   :  { %v426_v24 = vsel %vm394_vm1, %v988_v9, 256  ;;  %v427_v26 = vsel %vm395_vm2, %v991_v10, 256  ;;  %vm381_vm4 = vcmp.eq.f32.partialorder %v968_v62, %v337_v53  ;;  %v412_v25 = vsel %vm380_vm3, %v988_v9, 256 }
 0x1c1   :  { %vm640_vm5 = vcmp.lt.s32.totalorder %v426_v24, %v427_v26  ;;  %v413_v27 = vsel %vm381_vm4, %v991_v10, 256  ;;  %v1095_v30 = vcvt.s32.f32 %v483_v49  ;;  %v1097_v31 = vcvt.s32.f32 %v627_v56 }
 0x1c2   :  { %vm528_vm6 = vcmp.lt.s32.totalorder %v412_v25, %v413_v27  ;;  %v361_v54 = vpop.xlane.xlu0 %360  ;;  %v340_v57 = vpop.xlane.xlu1 %339  ;;  %v1100_v60 = vsel %vm512_vm0, %v410_v15, %v411_v16  ;;  %v1102_v28 = vsel %vm640_vm5, %v426_v24, %v427_v26  ;;  %v1109_v62 = vcvt.s32.f32 %v611_v21 }
 0x1c3   :  { %502 = vmin.xlane.f32.xlu0 %v1079_v19  ;;  %486 = vmin.xlane.f32.xlu1 %v1095_v30  ;;  %vm396_vm7 = vcmp.eq.f32.partialorder %v966_v61, %v361_v54  ;;  %vm397_vm8 = vcmp.eq.f32.partialorder %v970_v63, %v361_v54  ;;  %vm382_vm9 = vcmp.eq.f32.partialorder %v974_v1, %v340_v57  ;;  %v515_v61 = vshra.s32 %v1100_v60, 16 }
 0x1c4   :  { %v428_v33 = vsel %vm396_vm7, %v988_v9, 256  ;;  %v429_v32 = vsel %vm397_vm8, %v991_v10, 256  ;;  %vm383_vm10 = vcmp.eq.f32.partialorder %v980_v4, %v340_v57  ;;  %v414_v36 = vsel %vm382_vm9, %v988_v9, 256 }
 0x1c5   :  { %vm656_vm11 = vcmp.lt.s32.totalorder %v428_v33, %v429_v32  ;;  %v415_v38 = vsel %vm383_vm10, %v991_v10, 256  ;;  %v1117_v41 = vsel %vm528_vm6, %v412_v25, %v413_v27  ;;  %v1134_v44 = vcvt.s32.f32 %v515_v61 }
 0x1c6   :  { %vm544_vm12 = vcmp.lt.s32.totalorder %v414_v36, %v415_v38  ;;  %v364_v63 = vpop.xlane.xlu1 %363  ;;  %v531_v1 = vshra.s32 %v1117_v41, 16  ;;  %v1121_v43 = vsel %vm656_vm11, %v428_v33, %v429_v32  ;;  %v643_v58 = vshra.s32 %v1102_v28, 16 }
 0x1c7   :  { %630 = vmin.xlane.f32.xlu0 %v1097_v31  ;;  %614 = vmin.xlane.f32.xlu1 %v1109_v62  ;;  %vm398_vm13 = vcmp.eq.f32.partialorder %v976_v2, %v364_v63  ;;  %vm399_vm14 = vcmp.eq.f32.partialorder %v982_v5, %v364_v63  ;;  %v659_v4 = vshra.s32 %v1121_v43, 16  ;;  %v1128_v37 = vsel %vm544_vm12, %v414_v36, %v415_v38 }
 0x1c8   :  { %v430_v47 = vsel %vm398_vm13, %v988_v9, 256  ;;  %v431_v39 = vsel %vm399_vm14, %v991_v10, 256  ;;  %v1132_v40 = vcvt.s32.f32 %v531_v1  ;;  %v1143_v5 = vcvt.s32.f32 %v643_v58 }
 0x1c9   :  { %vm672_vm15 = vcmp.lt.s32.totalorder %v430_v47, %v431_v39  ;;  %v1141_v2 = vcvt.s32.f32 %v659_v4  ;;  %v547_v9 = vshra.s32 %v1128_v37, 16  ;;  %v434_v42 = vand.u32 65535, %v1001_v18 }
 0x1ca   :  { %v1137_v59 = vsel %vm672_vm15, %v430_v47, %v431_v39  ;;  %v562_v13 = vand.u32 65535, %v1012_v29  ;;  %v466_v16 = vand.u32 65535, %v1024_v34  ;;  %v450_v49 = vand.u32 65535, %v1026_v35 }
 0x1cb   :  { %534 = vmin.xlane.f32.xlu0 %v1132_v40  ;;  %518 = vmin.xlane.f32.xlu1 %v1134_v44  ;;  %v1148_v10 = vcvt.s32.f32 %v547_v9  ;;  %v675_v0 = vshra.s32 %v1137_v59, 16  ;;  %v436_v48 = vcvt.s32.f32 %v434_v42  ;;  %v594_v29 = vand.u32 65535, %v1040_v52 }
 0x1cc   :  { %v564_v15 = vcvt.s32.f32 %v562_v13  ;;  %v452_v21 = vcvt.s32.f32 %v450_v49  ;;  %v578_v56 = vand.u32 65535, %v1008_v22  ;;  %v498_v52 = vand.u32 65535, %v1061_v50 }
 0x1cd   :  { %v1152_v3 = vcvt.s32.f32 %v675_v0  ;;  %v596_v26 = vcvt.s32.f32 %v594_v29  ;;  %v482_v22 = vand.u32 65535, %v1043_v55  ;;  %v626_v50 = vand.u32 65535, %v1081_v20 }
 0x1ce   :  { %v580_v25 = vcvt.s32.f32 %v578_v56  ;;  %v500_v57 = vcvt.s32.f32 %v498_v52  ;;  %v610_v55 = vand.u32 65535, %v1063_v11  ;;  %v530_v20 = vand.u32 65535, %v1117_v41 }
 0x1cf   :  { %662 = vmin.xlane.f32.xlu0 %v1141_v2  ;;  %646 = vmin.xlane.f32.xlu1 %v1143_v5  ;;  %v484_v33 = vcvt.s32.f32 %v482_v22  ;;  %v628_v38 = vcvt.s32.f32 %v626_v50  ;;  %v514_v11 = vand.u32 65535, %v1100_v60  ;;  %v658_v41 = vand.u32 65535, %v1121_v43 }
 0x1d0   :  { %v612_v61 = vcvt.s32.f32 %v610_v55  ;;  %v532_v4 = vcvt.s32.f32 %v530_v20  ;;  %v642_v60 = vand.u32 65535, %v1102_v28  ;;  %v546_v43 = vand.u32 65535, %v1128_v37 }
 0x1d1   :  { %v516_v47 = vcvt.s32.f32 %v514_v11  ;;  %v660_v9 = vcvt.s32.f32 %v658_v41 }
 0x1d2   :  { %v644_v0 = vcvt.s32.f32 %v642_v60  ;;  %v548_v42 = vcvt.s32.f32 %v546_v43 }
 0x1d3   :  { %550 = vmin.xlane.f32.xlu1 %v1148_v10 }
 0x1d7   :  { %678 = vmin.xlane.f32.xlu1 %v1152_v3 }
 0x23c   :  { %v1156_v45 = vpop.xlane.xlu0 %438 }
 0x23d   :  { %vm440_vm0 = vcmp.eq.f32.partialorder %v1010_v23, %v1156_v45  ;;  %v468_v23 = vcvt.s32.f32 %v466_v16  ;;  %v445_v13 = vcvt.f32.s32 %v1156_v45 }
 0x23e   :  { %v441_v12 = vsel %vm440_vm0, %v436_v48, inf  ;;  %v674_v48 = vand.u32 65535, %v1137_v59  ;;  %vm688_vm0 = vcmask 7168  }
 0x23f   :  { %442 = vmin.xlane.f32.xlu0 %v441_v12  ;;  %v446_v16 = vshll.u32 %v445_v13, 16 }
 0x244   :  { %v1161_v14 = vpop.xlane.xlu0 %566 }
 0x245   :  { %vm568_vm1 = vcmp.eq.f32.partialorder %v1036_v46, %v1161_v14 }
 0x246   :  { %v569_v18 = vsel %vm568_vm1, %v564_v15, inf }
 0x247   :  { %570 = vmin.xlane.f32.xlu0 %v569_v18  ;;  %v573_v18 = vcvt.f32.s32 %v1161_v14 }
 0x248   :  { %v1167_v51 = vpop.xlane.xlu0 %470  ;;  %v1169_v53 = vpop.xlane.xlu1 %454 }
 0x249   :  { %vm472_vm2 = vcmp.eq.f32.partialorder %v1054_v6, %v1167_v51  ;;  %vm456_vm3 = vcmp.eq.f32.partialorder %v1056_v7, %v1169_v53 }
 0x24a   :  { %v473_v34 = vsel %vm472_vm2, %v468_v23, inf  ;;  %v457_v35 = vsel %vm456_vm3, %v452_v21, inf  ;;  %v461_v21 = vcvt.f32.s32 %v1169_v53 }
 0x24b   :  { %474 = vmin.xlane.f32.xlu0 %v473_v34  ;;  %458 = vmin.xlane.f32.xlu1 %v457_v35 }
 0x24c   :  { %v1177_v46 = vpop.xlane.xlu0 %598  ;;  %v1179_v24 = vpop.xlane.xlu1 %582 }
 0x24d   :  { %vm600_vm4 = vcmp.eq.f32.partialorder %v1076_v17, %v1177_v46  ;;  %vm584_vm5 = vcmp.eq.f32.partialorder %v1059_v8, %v1179_v24  ;;  %v605_v34 = vcvt.f32.s32 %v1177_v46  ;;  %v589_v14 = vcvt.f32.s32 %v1179_v24 }
 0x24e   :  { %v601_v6 = vsel %vm600_vm4, %v596_v26, inf  ;;  %v585_v7 = vsel %vm584_vm5, %v580_v25, inf  ;;  %v462_v25 = vshll.u32 %v461_v21, 16 }
 0x24f   :  { %602 = vmin.xlane.f32.xlu0 %v601_v6  ;;  %586 = vmin.xlane.f32.xlu1 %v585_v7  ;;  %v606_v53 = vshll.u32 %v605_v34, 16  ;;  %v590_v46 = vshll.u32 %v589_v14, 16 }
 0x250   :  { %v1187_v27 = vpop.xlane.xlu0 %502  ;;  %v1189_v54 = vpop.xlane.xlu1 %486 }
 0x251   :  { %vm504_vm6 = vcmp.eq.f32.partialorder %v1079_v19, %v1187_v27  ;;  %vm488_vm7 = vcmp.eq.f32.partialorder %v1095_v30, %v1189_v54  ;;  %v509_v7 = vcvt.f32.s32 %v1187_v27  ;;  %v493_v50 = vcvt.f32.s32 %v1189_v54 }
 0x252   :  { %v505_v8 = vsel %vm504_vm6, %v500_v57, inf  ;;  %v489_v17 = vsel %vm488_vm7, %v484_v33, inf }
 0x253   :  { %506 = vmin.xlane.f32.xlu0 %v505_v8  ;;  %490 = vmin.xlane.f32.xlu1 %v489_v17  ;;  %v510_v27 = vshll.u32 %v509_v7, 16  ;;  %v494_v54 = vshll.u32 %v493_v50, 16 }
 0x254   :  { %v1197_v32 = vpop.xlane.xlu0 %630  ;;  %v1199_v36 = vpop.xlane.xlu1 %614 }
 0x255   :  { %vm632_vm8 = vcmp.eq.f32.partialorder %v1097_v31, %v1197_v32  ;;  %vm616_vm9 = vcmp.eq.f32.partialorder %v1109_v62, %v1199_v36  ;;  %v621_v11 = vcvt.f32.s32 %v1199_v36 }
 0x256   :  { %v633_v19 = vsel %vm632_vm8, %v628_v38, inf  ;;  %v617_v30 = vsel %vm616_vm9, %v612_v61, inf  ;;  %v637_v38 = vcvt.f32.s32 %v1197_v32 }
 0x257   :  { %634 = vmin.xlane.f32.xlu0 %v633_v19  ;;  %618 = vmin.xlane.f32.xlu1 %v617_v30  ;;  %v622_v36 = vshll.u32 %v621_v11, 16 }
 0x258   :  { %v1207_v63 = vpop.xlane.xlu0 %534  ;;  %v1209_v1 = vpop.xlane.xlu1 %518  ;;  %v638_v32 = vshll.u32 %v637_v38, 16 }
 0x259   :  { %vm536_vm10 = vcmp.eq.f32.partialorder %v1132_v40, %v1207_v63  ;;  %vm520_vm11 = vcmp.eq.f32.partialorder %v1134_v44, %v1209_v1  ;;  %v541_v41 = vcvt.f32.s32 %v1207_v63 }
 0x25a   :  { %v537_v31 = vsel %vm536_vm10, %v532_v4, inf  ;;  %v521_v62 = vsel %vm520_vm11, %v516_v47, inf }
 0x25b   :  { %538 = vmin.xlane.f32.xlu0 %v537_v31  ;;  %522 = vmin.xlane.f32.xlu1 %v521_v62  ;;  %v525_v62 = vcvt.f32.s32 %v1209_v1  ;;  %v542_v63 = vshll.u32 %v541_v41, 16 }
 0x25c   :  { %v1217_v39 = vpop.xlane.xlu0 %662  ;;  %v1219_v58 = vpop.xlane.xlu1 %646 }
 0x25d   :  { %vm664_vm12 = vcmp.eq.f32.partialorder %v1141_v2, %v1217_v39  ;;  %vm648_vm13 = vcmp.eq.f32.partialorder %v1143_v5, %v1219_v58  ;;  %v676_v2 = vcvt.s32.f32 %v674_v48  ;;  %v526_v1 = vshll.u32 %v525_v62, 16 }
 0x25e   :  { %v665_v28 = vsel %vm664_vm12, %v660_v9, inf  ;;  %v649_v40 = vsel %vm648_vm13, %v644_v0, inf }
 0x25f   :  { %666 = vmin.xlane.f32.xlu0 %v665_v28  ;;  %650 = vmin.xlane.f32.xlu1 %v649_v40  ;;  %v669_v40 = vcvt.f32.s32 %v1217_v39 }
 0x260   :  { %v1226_v44 = vpop.xlane.xlu1 %550 }
 0x261   :  { %vm552_vm14 = vcmp.eq.f32.partialorder %v1148_v10, %v1226_v44  ;;  %v477_v10 = vcvt.f32.s32 %v1167_v51  ;;  %v670_v39 = vshll.u32 %v669_v40, 16 }
 0x262   :  { %v553_v12 = vsel %vm552_vm14, %v548_v42, inf }
 0x263   :  { %554 = vmin.xlane.f32.xlu1 %v553_v12  ;;  %v478_v56 = vshll.u32 %v477_v10, 16  ;;  %v653_v12 = vcvt.f32.s32 %v1219_v58  ;;  %v557_v58 = vcvt.f32.s32 %v1226_v44 }
 0x264   :  { %v1231_v37 = vpop.xlane.xlu1 %678 }
 0x265   :  { %vm680_vm15 = vcmp.eq.f32.partialorder %v1152_v3, %v1231_v37  ;;  %v574_v3 = vshll.u32 %v573_v18, 16 }
 0x266   :  { %v681_v5 = vsel %vm680_vm15, %v676_v2, inf }
 0x267   :  { %682 = vmin.xlane.f32.xlu1 %v681_v5 }
 0x2cc   :  { %v443_v15 = vpop.xlane.xlu0 %442 }
 0x2cd   :  { %v444_v49 = vcvt.f32.s32 %v443_v15 }
 0x2cf   :  { %v447_v59 = vadd.s32 %v446_v16, %v444_v49 }
 0x2d1   :  { %689 = vst.msk [vmem:[%s1317_s2] sm:$0xff] %vm688_vm0, %v447_v59  ;;  %v654_v59 = vshll.u32 %v653_v12, 16 }
 0x2d4   :  { %v571_v23 = vpop.xlane.xlu0 %570 }
 0x2d5   :  { %v572_v29 = vcvt.f32.s32 %v571_v23 }
 0x2d7   :  { %v575_v45 = vadd.s32 %v574_v3, %v572_v29  ;;  %v558_v29 = vshll.u32 %v557_v58, 16 }
 0x2d8   :  { %v475_v35 = vpop.xlane.xlu0 %474  ;;  %v459_v26 = vpop.xlane.xlu1 %458 }
 0x2d9   :  { %697 = vst.msk [vmem:[%s1317_s2 + $0x40] sm:$0xff] %vm688_vm0, %v575_v45  ;;  %v476_v51 = vcvt.f32.s32 %v475_v35  ;;  %v460_v52 = vcvt.f32.s32 %v459_v26  ;;  %v685_v45 = vcvt.f32.s32 %v1231_v37 }
 0x2db   :  { %v479_v22 = vadd.s32 %v478_v56, %v476_v51  ;;  %v463_v6 = vadd.s32 %v462_v25, %v460_v52  ;;  %v686_v35 = vshll.u32 %v685_v45, 16 }
 0x2dc   :  { %v603_v57 = vpop.xlane.xlu0 %602  ;;  %v587_v33 = vpop.xlane.xlu1 %586 }
 0x2dd   :  { %691 = vst.msk [vmem:[%s1317_s2 + $0x10] sm:$0xff] %vm688_vm0, %v479_v22  ;;  %690 = vst.msk [vmem:[%s1317_s2 + $0x8] sm:$0xff] %vm688_vm0, %v463_v6  ;;  %v604_v24 = vcvt.f32.s32 %v603_v57  ;;  %v588_v55 = vcvt.f32.s32 %v587_v33 }
 0x2df   :  { %v607_v8 = vadd.s32 %v606_v53, %v604_v24  ;;  %v591_v17 = vadd.s32 %v590_v46, %v588_v55 }
 0x2e0   :  { %v507_v61 = vpop.xlane.xlu0 %506  ;;  %v491_v20 = vpop.xlane.xlu1 %490 }
 0x2e1   :  { %699 = vst.msk [vmem:[%s1317_s2 + $0x50] sm:$0xff] %vm688_vm0, %v607_v8  ;;  %698 = vst.msk [vmem:[%s1317_s2 + $0x48] sm:$0xff] %vm688_vm0, %v591_v17  ;;  %v508_v19 = vcvt.f32.s32 %v507_v61  ;;  %v492_v30 = vcvt.f32.s32 %v491_v20 }
 0x2e3   :  { %v511_v4 = vadd.s32 %v510_v27, %v508_v19  ;;  %v495_v47 = vadd.s32 %v494_v54, %v492_v30 }
 0x2e4   :  { %v635_v60 = vpop.xlane.xlu0 %634  ;;  %v619_v31 = vpop.xlane.xlu1 %618 }
 0x2e5   :  { %693 = vst.msk [vmem:[%s1317_s2 + $0x20] sm:$0xff] %vm688_vm0, %v511_v4  ;;  %692 = vst.msk [vmem:[%s1317_s2 + $0x18] sm:$0xff] %vm688_vm0, %v495_v47  ;;  %v636_v9 = vcvt.f32.s32 %v635_v60  ;;  %v620_v0 = vcvt.f32.s32 %v619_v31 }
 0x2e7   :  { %v639_v43 = vadd.s32 %v638_v32, %v636_v9  ;;  %v623_v28 = vadd.s32 %v622_v36, %v620_v0 }
 0x2e8   :  { %v539_v42 = vpop.xlane.xlu0 %538  ;;  %v523_v48 = vpop.xlane.xlu1 %522 }
 0x2e9   :  { %701 = vst.msk [vmem:[%s1317_s2 + $0x60] sm:$0xff] %vm688_vm0, %v639_v43  ;;  %700 = vst.msk [vmem:[%s1317_s2 + $0x58] sm:$0xff] %vm688_vm0, %v623_v28  ;;  %v540_v2 = vcvt.f32.s32 %v539_v42  ;;  %v524_v5 = vcvt.f32.s32 %v523_v48 }
 0x2eb   :  { %v543_v13 = vadd.s32 %v542_v63, %v540_v2  ;;  %v527_v15 = vadd.s32 %v526_v1, %v524_v5 }
 0x2ec   :  { %v667_v16 = vpop.xlane.xlu0 %666  ;;  %v651_v49 = vpop.xlane.xlu1 %650 }
 0x2ed   :  { %695 = vst.msk [vmem:[%s1317_s2 + $0x30] sm:$0xff] %vm688_vm0, %v543_v13  ;;  %694 = vst.msk [vmem:[%s1317_s2 + $0x28] sm:$0xff] %vm688_vm0, %v527_v15  ;;  %v668_v18 = vcvt.f32.s32 %v667_v16  ;;  %v652_v10 = vcvt.f32.s32 %v651_v49 }
 0x2ef   :  { %v671_v23 = vadd.s32 %v670_v39, %v668_v18  ;;  %v655_v3 = vadd.s32 %v654_v59, %v652_v10 }
 0x2f0   :  { %v555_v21 = vpop.xlane.xlu1 %554 }
 0x2f1   :  { %703 = vst.msk [vmem:[%s1317_s2 + $0x70] sm:$0xff] %vm688_vm0, %v671_v23  ;;  %702 = vst.msk [vmem:[%s1317_s2 + $0x68] sm:$0xff] %vm688_vm0, %v655_v3  ;;  %v556_v44 = vcvt.f32.s32 %v555_v21 }
 0x2f3   :  { %v559_v56 = vadd.s32 %v558_v29, %v556_v44 }
 0x2f4   :  { %v683_v34 = vpop.xlane.xlu1 %682 }
 0x2f5   :  { %696 = vst.msk [vmem:[%s1317_s2 + $0x38] sm:$0xff] %vm688_vm0, %v559_v56  ;;  %v684_v37 = vcvt.f32.s32 %v683_v34 }
 0x2f7   :  { %v687_v26 = vadd.s32 %v686_v35, %v684_v37 }
 0x2f9   :  { %704 = vst.msk [vmem:[%s1317_s2 + $0x78] sm:$0xff] %vm688_vm0, %v687_v26 }

</bundles_post_ra>
